<compile_context>
chip_gen: v7x
topology: tpu7x:2x2x1
jax: 0.10.0
libtpu: 0.0.40
codegen_flags: <defaults>
</compile_context>

<pallas_src>
import jax
import jax.numpy as jnp
from jax import lax
from jax.experimental import pallas as pl
from jax.experimental.pallas import tpu as pltpu


_VMEM_LIMIT = 32 * 1024 * 1024     # explicit scoped-VMEM limit (v5e/v6e/v7x safe)
_BLOCK_BUDGET = 1 << 20            # ~1 MiB target per (single) input block
_MAX_ROWS = 32                     # cap on H rows per block


def _pick_rows(H, bytes_per_row, multiple=1):
    """Largest divisor of H (multiple of `multiple`) fitting the block budget."""
    cap = int(_BLOCK_BUDGET // max(1, bytes_per_row))
    cap = max(multiple, min(_MAX_ROWS, cap))
    best = None
    for t in range(multiple, H + 1, multiple):
        if H % t == 0 and t <= cap:
            best = t
    return best if best is not None else H


# ------------------------------------------------------------------ kernels --

def _lateral_kernel(x_ref, w_ref, b_ref, o_ref):
    # 1x1 conv: single 2-D bf16 matmul on the MXU, f32 accumulation.
    th, W, cin = x_ref.shape
    cout = w_ref.shape[1]
    x2 = x_ref[...].reshape(th * W, cin)                       # (tH*W, Cin) bf16
    y = jnp.dot(x2, w_ref[...], preferred_element_type=jnp.float32)
    y = y + b_ref[...]                                         # (1, Cout) bias
    o_ref[...] = y.reshape(th, W, cout).astype(o_ref.dtype)


def _lateral_up_add_kernel(x_ref, u_ref, w_ref, b_ref, o_ref):
    # Fused: 1x1 lateral conv + nearest-2x (H direction) upsample + add.
    th, W, cin = x_ref.shape
    cout = w_ref.shape[1]
    x2 = x_ref[...].reshape(th * W, cin)
    y = jnp.dot(x2, w_ref[...], preferred_element_type=jnp.float32)
    y = (y + b_ref[...]).reshape(th, W, cout)                  # (tH, W, Cout) f32
    s = u_ref[...]                                             # (tH//2, W, Cout) bf16
    hs = s.shape[0]
    up = jnp.broadcast_to(s[:, None], (hs, 2, W, cout)).reshape(2 * hs, W, cout)
    o_ref[...] = (y + up.astype(jnp.float32)).astype(o_ref.dtype)


def _make_conv3x3_kernel(nbh, th, w_out):
    """3x3 conv (pad 1) over H row-blocks: manual double-buffered halo DMA,
    9 accumulating bf16 MXU taps, f32 accumulator.  Grid = (N, nbh)."""

    def kernel(xp_ref, w_ref, b_ref, o_ref, xbuf, sem):
        n = pl.program_id(0)
        r = pl.program_id(1)
        slot = lax.rem(r, 2)

        def make_copy(row_block, slot_):
            return pltpu.make_async_copy(
                xp_ref.at[n, pl.ds(row_block * th, th + 2)],   # (tH+2, W+2, C) halo
                xbuf.at[slot_],
                sem.at[slot_])

        @pl.when(r == 0)
        def _():
            make_copy(0, 0).start()                            # prime this image

        @pl.when(r + 1 < nbh)
        def _():
            make_copy(r + 1, 1 - slot).start()                 # prefetch next block

        make_copy(r, slot).wait()

        x = xbuf[slot]                                         # (tH+2, W+2, C) bf16
        cin = x.shape[-1]
        cout = w_ref.shape[-1]
        acc = jnp.zeros((th, w_out, cout), jnp.float32)
        for dh in range(3):
            for dw in range(3):
                win = x[dh:dh + th, dw:dw + w_out]             # (tH, W, C)
                wt = jnp.broadcast_to(w_ref[3 * dh + dw][None], (th, cin, cout))
                acc = acc + jnp.einsum('hwc,hcd->hwd', win, wt,
                                       preferred_element_type=jnp.float32)
        o_ref[...] = (acc + b_ref[...]).astype(o_ref.dtype)

    return kernel


def _subsample_kernel(x_ref, o_ref):
    # F.max_pool2d(x, 1, stride=2): H stride handled by the index_map,
    # W stride via a strided sublane read.
    wo = o_ref.shape[1]
    o_ref[...] = x_ref[:, pl.ds(0, wo, 2), :]


# ------------------------------------------------------------------ wrappers --

def _conv1x1(x, w, b):
    # x: (N, H, W, Cin) bf16
    N, H, W, Cin = x.shape
    Cout = w.shape[1]
    th = _pick_rows(H, W * max(Cin, Cout) * 2)
    return pl.pallas_call(
        _lateral_kernel,
        out_shape=jax.ShapeDtypeStruct((N, H, W, Cout), jnp.bfloat16),
        grid=(N, H // th),
        in_specs=[
            pl.BlockSpec((None, th, W, Cin), lambda n, j: (n, j, 0, 0)),
            pl.BlockSpec((Cin, Cout), lambda n, j: (0, 0)),
            pl.BlockSpec((1, Cout), lambda n, j: (0, 0)),
        ],
        out_specs=pl.BlockSpec((None, th, W, Cout), lambda n, j: (n, j, 0, 0)),
        compiler_params=pltpu.CompilerParams(
            dimension_semantics=("parallel", "parallel"),
            vmem_limit_bytes=_VMEM_LIMIT),
    )(x, w.astype(jnp.bfloat16), b.reshape(1, -1).astype(jnp.float32))


def _conv1x1_up_add(x, upw, w, b):
    # x: (N, H, W, Cin) bf16, upw: (N, H//2, W, Cout) bf16 (coarse, W already 2x)
    N, H, W, Cin = x.shape
    Cout = w.shape[1]
    th = _pick_rows(H, W * max(Cin, Cout) * 2, multiple=2)
    return pl.pallas_call(
        _lateral_up_add_kernel,
        out_shape=jax.ShapeDtypeStruct((N, H, W, Cout), jnp.bfloat16),
        grid=(N, H // th),
        in_specs=[
            pl.BlockSpec((None, th, W, Cin), lambda n, j: (n, j, 0, 0)),
            pl.BlockSpec((None, th // 2, W, Cout), lambda n, j: (n, j, 0, 0)),
            pl.BlockSpec((Cin, Cout), lambda n, j: (0, 0)),
            pl.BlockSpec((1, Cout), lambda n, j: (0, 0)),
        ],
        out_specs=pl.BlockSpec((None, th, W, Cout), lambda n, j: (n, j, 0, 0)),
        compiler_params=pltpu.CompilerParams(
            dimension_semantics=("parallel", "parallel"),
            vmem_limit_bytes=_VMEM_LIMIT),
    )(x, upw, w.astype(jnp.bfloat16), b.reshape(1, -1).astype(jnp.float32))


def _conv3x3(lat, w, b):
    # lat: (N, H, W, C) bf16; w: (3, 3, C, Cout) f32; b: (Cout,) f32
    N, H, W, C = lat.shape
    Cout = w.shape[-1]
    # TODO(synk): fuse the zero-halo padding into the producer kernel's output.
    xp = jnp.pad(lat, ((0, 0), (1, 1), (1, 1), (0, 0)))
    th = _pick_rows(H, (W + 2) * max(C, Cout) * 2)
    nbh = H // th
    w9 = w.reshape(9, C, Cout).astype(jnp.bfloat16)
    kernel = _make_conv3x3_kernel(nbh, th, W)
    return pl.pallas_call(
        kernel,
        out_shape=jax.ShapeDtypeStruct((N, H, W, Cout), jnp.float32),
        grid=(N, nbh),
        in_specs=[
            pl.BlockSpec(memory_space=pl.ANY),           # padded lateral in HBM
            pl.BlockSpec((9, C, Cout), lambda n, r: (0, 0, 0)),
            pl.BlockSpec((1, Cout), lambda n, r: (0, 0)),
        ],
        out_specs=pl.BlockSpec((None, th, W, Cout), lambda n, r: (n, r, 0, 0)),
        scratch_shapes=[
            pltpu.VMEM((2, th + 2, W + 2, C), jnp.bfloat16),
            pltpu.SemaphoreType.DMA((2,)),
        ],
        compiler_params=pltpu.CompilerParams(
            dimension_semantics=("parallel", "arbitrary"),
            vmem_limit_bytes=_VMEM_LIMIT),
    )(xp, w9, b.reshape(1, -1).astype(jnp.float32))


def _subsample2(x):
    # F.max_pool2d(x, kernel_size=1, stride=2) == x[:, ::2, ::2, :]  (NHWC)
    N, H, W, C = x.shape
    Ho, Wo = (H + 1) // 2, (W + 1) // 2
    return pl.pallas_call(
        _subsample_kernel,
        out_shape=jax.ShapeDtypeStruct((N, Ho, Wo, C), x.dtype),
        grid=(N, Ho),
        in_specs=[pl.BlockSpec((None, 1, W, C), lambda n, j: (n, 2 * j, 0, 0))],
        out_specs=pl.BlockSpec((None, 1, Wo, C), lambda n, j: (n, j, 0, 0)),
        compiler_params=pltpu.CompilerParams(
            dimension_semantics=("parallel", "parallel"),
            vmem_limit_bytes=_VMEM_LIMIT),
    )(x)


def _nearest_resize_nhwc(x, H, W):
    # PyTorch 'nearest': src = floor(dst * src_size / dst_size)
    N, Hs, Ws, C = x.shape
    ri = (jnp.arange(H) * Hs) // H
    ci = (jnp.arange(W) * Ws) // W
    return x[:, ri][:, :, ci]


# --------------------------------------------------------------------- glue --

def init_fpn_params(key, in_channels, out_channels):
    params = {"lateral": [], "fpn": []}
    for cin in in_channels:
        key, k1, k2, k3, k4 = jax.random.split(key, 5)
        params["lateral"].append({
            "w": 0.1 * jax.random.normal(k1, (cin, out_channels), jnp.float32),
            "b": 0.1 * jax.random.normal(k2, (out_channels,), jnp.float32),
        })
        params["fpn"].append({
            "w": 0.1 * jax.random.normal(
                k3, (3, 3, out_channels, out_channels), jnp.float32),
            "b": 0.1 * jax.random.normal(k4, (out_channels,), jnp.float32),
        })
    return params


def fpn_forward_nhwc(params, inputs_nhwc, num_outs):
    """FPN.forward on NHWC inputs (default config: start_level=0, end_level=-1,
    add_extra_convs=False, nearest upsampling)."""
    xs = [x.astype(jnp.bfloat16) for x in inputs_nhwc]
    used = len(xs)

    laterals = [None] * used
    p = params["lateral"][used - 1]
    laterals[used - 1] = _conv1x1(xs[used - 1], p["w"], p["b"])
    for i in range(used - 2, -1, -1):
        p = params["lateral"][i]
        N, H, W, _ = xs[i].shape
        _, Hc, Wc, _ = laterals[i + 1].shape
        if H == 2 * Hc and W == 2 * Wc:
            # TODO(synk): W-direction nearest repeat is a sublane interleave;
            # kept host-side on the 4x-smaller coarse map (H repeat + add fused).
            upw = jnp.repeat(laterals[i + 1], 2, axis=2)
            laterals[i] = _conv1x1_up_add(xs[i], upw, p["w"], p["b"])
        else:
            # TODO(synk): general (non exact-2x) nearest resize + add not fused.
            up = _nearest_resize_nhwc(laterals[i + 1], H, W)
            lat = _conv1x1(xs[i], p["w"], p["b"])
            laterals[i] = (lat.astype(jnp.float32) +
                           up.astype(jnp.float32)).astype(jnp.bfloat16)

    outs = [_conv3x3(laterals[i], params["fpn"][i]["w"], params["fpn"][i]["b"])
            for i in range(used)]

    # extra levels (add_extra_convs=False): max_pool2d(out[-1], 1, stride=2)
    for _ in range(num_outs - used):
        outs.append(_subsample2(outs[-1]))
    return tuple(outs)


def fpn_forward(params, inputs_nchw, num_outs):
    """PyTorch-layout entry point (NCHW in / NCHW out).
    TODO(synk): a backbone emitting NHWC can call fpn_forward_nhwc directly and
    skip these layout round-trips."""
    ins = [jnp.transpose(x, (0, 2, 3, 1)) for x in inputs_nchw]
    outs = fpn_forward_nhwc(params, ins, num_outs)
    return tuple(jnp.transpose(o, (0, 3, 1, 2)) for o in outs)


# ------------------------------------------------------ pure-JAX reference --

def fpn_reference(params, inputs_nchw, num_outs):
    dn = ('NCHW', 'OIHW', 'NCHW')

    def conv1x1(x, w, b):
        k = jnp.transpose(w, (1, 0))[:, :, None, None]
        return lax.conv_general_dilated(x, k, (1, 1), 'VALID',
                                        dimension_numbers=dn) \
            + b[None, :, None, None]

    def conv3x3(x, w, b):
        k = jnp.transpose(w, (3, 2, 0, 1))
        return lax.conv_general_dilated(x, k, (1, 1), ((1, 1), (1, 1)),
                                        dimension_numbers=dn) \
            + b[None, :, None, None]

    laterals = [conv1x1(x, p["w"], p["b"])
                for x, p in zip(inputs_nchw, params["lateral"])]
    used = len(laterals)
    for i in range(used - 1, 0, -1):
        up = jnp.repeat(jnp.repeat(laterals[i], 2, axis=2), 2, axis=3)
        laterals[i - 1] = laterals[i - 1] + up
    outs = [conv3x3(laterals[i], params["fpn"][i]["w"], params["fpn"][i]["b"])
            for i in range(used)]
    for _ in range(num_outs - used):
        outs.append(outs[-1][:, :, ::2, ::2])
    return tuple(outs)


# --------------------------------------------------------------------- main --

if __name__ == "__main__":
    in_channels = [8, 16, 32]
    out_channels = 16
    num_outs = 5
    N = 2
    spatial = [64, 32, 16]     # multiple H row-blocks exercised at level 0/1

    key = jax.random.PRNGKey(0)
    key, *ks = jax.random.split(key, len(in_channels) + 1)
    inputs = [jax.random.normal(k, (N, c, s, s), jnp.float32)
              for k, c, s in zip(ks, in_channels, spatial)]

    params = init_fpn_params(jax.random.PRNGKey(1), in_channels, out_channels)

    outs = fpn_forward(params, inputs, num_outs)
    outs = jax.block_until_ready(outs)

    refs = fpn_reference(params, inputs, num_outs)
    assert len(outs) == num_outs
    for o, r in zip(outs, refs):
        assert o.shape == r.shape, (o.shape, r.shape)
        # bf16 operands vs f32 reference -> bf16-level tolerance
        assert bool(jnp.allclose(o, r, rtol=3e-2, atol=5e-2)), \
            float(jnp.max(jnp.abs(o - r)))

    print("KERNEL_OK")
</pallas_src>

<mosaic_0001>
module attributes {stable_mosaic.version = 11 : i64} {
  func.func @_lateral_kernel(%arg0: i32, %arg1: i32, %arg2: memref<1x16x16x32xbf16, #tpu.memory_space<vmem>>, %arg3: memref<32x16xbf16, #tpu.memory_space<vmem>>, %arg4: memref<1x16xf32, #tpu.memory_space<vmem>>, %arg5: memref<1x16x16x16xbf16, #tpu.memory_space<vmem>>) attributes {dimension_semantics = [#tpu.dimension_semantics<parallel>, #tpu.dimension_semantics<parallel>], iteration_bounds = array<i64: 2, 1>, scalar_prefetch = 0 : i64, scratch_operands = 0 : i64, tpu.core_type = #tpu.core_type<tc>, window_params = [{transform_indices = @transform_0, window_bounds = array<i64: 1, 16, 16, 32>}, {pipeline_mode = #tpu.pipeline_mode<synchronous>, transform_indices = @transform_1, window_bounds = array<i64: 32, 16>}, {pipeline_mode = #tpu.pipeline_mode<synchronous>, transform_indices = @transform_2, window_bounds = array<i64: 1, 16>}, {transform_indices = @transform_3, window_bounds = array<i64: 1, 16, 16, 16>}]} {
    %c0 = arith.constant 0 : index
    %c0_0 = arith.constant 0 : index
    %c0_1 = arith.constant 0 : index
    %c0_2 = arith.constant 0 : index
    %0 = vector.load %arg2[%c0, %c0_0, %c0_1, %c0_2] : memref<1x16x16x32xbf16, #tpu.memory_space<vmem>>, vector<1x16x16x32xbf16>
    %1 = vector.shape_cast %0 : vector<1x16x16x32xbf16> to vector<16x16x32xbf16>
    %2 = vector.shape_cast %1 : vector<16x16x32xbf16> to vector<256x32xbf16>
    %c0_3 = arith.constant 0 : index
    %c0_4 = arith.constant 0 : index
    %3 = vector.load %arg3[%c0_3, %c0_4] : memref<32x16xbf16, #tpu.memory_space<vmem>>, vector<32x16xbf16>
    %cst = arith.constant dense<0.000000e+00> : vector<256x16xf32>
    %4 = tpu.matmul %2, %3, %cst {dimension_numbers = #tpu.dot_dimension_numbers<[1], [0], [0], [1], [0, 0, 1, 1], [], []>} : vector<256x32xbf16>, vector<32x16xbf16>, vector<256x16xf32> -> vector<256x16xf32>
    %c0_5 = arith.constant 0 : index
    %c0_6 = arith.constant 0 : index
    %5 = vector.load %arg4[%c0_5, %c0_6] : memref<1x16xf32, #tpu.memory_space<vmem>>, vector<1x16xf32>
    %6 = vector.broadcast %5 : vector<1x16xf32> to vector<256x16xf32>
    %7 = arith.addf %4, %6 : vector<256x16xf32>
    %8 = vector.shape_cast %7 : vector<256x16xf32> to vector<16x16x16xf32>
    %9 = arith.truncf %8 : vector<16x16x16xf32> to vector<16x16x16xbf16>
    %c0_7 = arith.constant 0 : index
    %c0_8 = arith.constant 0 : index
    %c0_9 = arith.constant 0 : index
    %c0_10 = arith.constant 0 : index
    %10 = vector.load %arg5[%c0_7, %c0_8, %c0_9, %c0_10] : memref<1x16x16x16xbf16, #tpu.memory_space<vmem>>, vector<1x16x16x16xbf16>
    %11 = vector.shape_cast %10 : vector<1x16x16x16xbf16> to vector<16x16x16xbf16>
    %12 = vector.shape_cast %9 : vector<16x16x16xbf16> to vector<1x16x16x16xbf16>
    tpu.vector_store %arg5[%c0_7, %c0_8, %c0_9, %c0_10], %12 {strides = array<i32>} : memref<1x16x16x16xbf16, #tpu.memory_space<vmem>>, vector<1x16x16x16xbf16>,
    return
  }
  func.func @transform_0(%arg0: i32, %arg1: i32) -> (i32, i32, i32, i32) {
    %c0_i32 = arith.constant 0 : i32
    %c0_i32_0 = arith.constant 0 : i32
    %c0_i32_1 = arith.constant 0 : i32
    return %arg0, %arg1, %c0_i32, %c0_i32_0 : i32, i32, i32, i32
  }
  func.func @transform_1(%arg0: i32, %arg1: i32) -> (i32, i32) {
    %c0_i32 = arith.constant 0 : i32
    %c0_i32_0 = arith.constant 0 : i32
    %c0_i32_1 = arith.constant 0 : i32
    return %c0_i32, %c0_i32_0 : i32, i32
  }
  func.func @transform_2(%arg0: i32, %arg1: i32) -> (i32, i32) {
    %c0_i32 = arith.constant 0 : i32
    %c0_i32_0 = arith.constant 0 : i32
    %c0_i32_1 = arith.constant 0 : i32
    return %c0_i32, %c0_i32_0 : i32, i32
  }
  func.func @transform_3(%arg0: i32, %arg1: i32) -> (i32, i32, i32, i32) {
    %c0_i32 = arith.constant 0 : i32
    %c0_i32_0 = arith.constant 0 : i32
    %c0_i32_1 = arith.constant 0 : i32
    return %arg0, %arg1, %c0_i32, %c0_i32_0 : i32, i32, i32, i32
  }
}

</mosaic_0001>

<bundles_post_ra>
// kernel: tpu_custom_call.1
= control target key start
LH: loop header
LB: loop body
LE: loop exit
PB: predicated region body
PF: predicated region fallthrough
CT: control target
= control target key end

     0   :  { %8 = vsyncpa [#allocation3], 0  ;;  %s1542_s0 = inlined_call_operand.hbm [shape: bf16[2,16,16,32], index: 0, kind: input, shape index: {}]   ;;  %s1543_s1 = inlined_call_operand.vmem [shape: bf16[32,16], index: 1, kind: input, shape index: {}]   ;;  %s1544_s2 = inlined_call_operand.vmem [shape: f32[1,16], index: 2, kind: input, shape index: {}]   ;;  %s1545_s3 = inlined_call_operand.hbm [shape: bf16[2,16,16,16], index: 3, kind: output, shape index: {}]  }
   0x1   :  { %10 = vsyncpa [#allocation3 + $0x1], 0 }
   0x2   :  { %11 = vsyncpa [#allocation4], 0 }
   0x3   :  { %13 = vsyncpa [#allocation4 + $0x1], 0  ;;  %s1219_s12 = smov 0   ;;  %s1221_s13 = smov 0  }
   0x4   :  { %s1223_s14 = smov 0   ;;  %s1225_s15 = smov 0  }
   0x5   :  { %s1227_s16 = smov 0   ;;  %s1229_s17 = smov 0  }
   0x6 LB: > { %s821_s18 = sadd.s32 4294967295, %s1191_s17   ;;  %s822_s19 = sadd.s32 4294967294, %s1191_s17   ;;  %s1191_s17 = sphi %s1229_s17, %s19_s17   ;;  %s1187_s16 = sphi %s1227_s16, %s1560_s16   ;;  %s1183_s15 = sphi %s1225_s15, %s1559_s15   ;;  %s1179_s14 = sphi %s1223_s14, %s1558_s14   ;;  %s1175_s13 = sphi %s1221_s13, %s1557_s13   ;;  %s1171_s12 = sphi %s1219_s12, %s1556_s12  }
   0x7   : > { %s31_s20 = sadd.s32 1, %s1187_s16  ;;  %s40_s21 = sadd.s32 1, %s1179_s14 }
   0x8   : > { %p33_p0 = scmp.ge.s32.totalorder %s31_s20, 2  ;;  %p47_p1 = scmp.ne.s32.totalorder %s1179_s14, %s1175_s13 }
   0x9   : > { %p48_p2 = scmp.eq.s32.totalorder %s1191_s17, 0  ;;  %p53_p3 = scmp.ne.s32.totalorder %s1175_s13, %s1171_s12 }
   0xa   : > { %s1562_s20 = smov (%p33_p0, %s31_s20), 0  ;;  %p54_p5 = scmp.eq.s32.totalorder %s821_s18, 0 }
   0xb   : > { %p1260_p4 = por %p48_p2, %p47_p1  ;;  %s35_s23 = ssub.s32 %s1187_s16, %s1562_s20 }
   0xc   : > { %p121_p6 = scmp.eq.s32.totalorder %s821_s18, 1  ;;  %p38_p7 = scmp.eq.s32.totalorder %s35_s23, 0 }
   0xd   : > { %p1266_p8 = por %p54_p5, %p53_p3  ;;  %p127_p10 = scmp.eq.s32.totalorder %s822_s19, 1 }
   0xe   : > { %p1270_p9 = por %p121_p6, %p47_p1  ;;  %p1007_p13 = scmp.lt.s32.totalorder %s1191_s17, 2 }
   0xf   : > { %s1275_s26 = scalar_select %p38_p7, %s1179_s14, %s40_s21  }
  0x10   : > { %s1549_s25 = scalar_select %p1270_p9, 1, 0 }
  0x11   : > { %p1277_p11 = por %p127_p10, %p53_p3  ;;  %s153_s28 = sand.u32 1, %s1179_s14  }
  0x12   : > { %s825_s29 = sshll.u32 %s153_s28, 7  ;;  %s903_s30 = sshll.u32 %s1187_s16, 11 }
  0x13   : > { %s1550_s27 = scalar_select %p1277_p11, 1, 0 }
  0x14   : > { %s1288_s6 = scalar_lea.hbm %s1542_s0, %s903_s30  ;;  %s157_s7 = scalar_lea.vmem [#allocation2], %s825_s29 }
  0x15   : > { %s167_s8 = sshll.u32 %s157_s7, 4  ;;  %p1294_p0 = pnand %p1007_p13, %p1260_p4  ;;  %s1290_s8 = int_to_ptr.vmem [resolvable:$true] %s167_s8 }
  0x16   : > { %s1299_s10 = scalar_lea.sflag [#allocation3], %s153_s28  ;;  %s1079_s11 = scalar_lea.hbm %s1288_s6, 2048 }
  0x17   : > { %p1080_p2 = scmp.ne.s32.totalorder %s1288_s6, %s1079_s11  ;;  %p1081_p3 = pneg %p1294_p0 }
  0x18   : > { %s1084_s21 = scalar_lea.hbm %s1542_s0, 4096  ;;  %p1085_p4 = scmp.lt.u32.totalorder %s1288_s6, %s1542_s0 }
  0x19   : > { %p1082_p5 = pnand %p1081_p3, %p1080_p2  ;;  %p1086_p7 = scmp.lt.u32.totalorder %s1084_s21, %s1079_s11 }
  0x1a   : > { %p1088_p13 = scmp.lt.u32.totalorder %s1079_s11, %s1288_s6 }
  0x1b   : > { %p1083_p6 = pneg %p1082_p5  ;;  %p1087_p10 = por %p1086_p7, %p1085_p4 }
  0x1d   : > { %p1089_p12 = por %p1088_p13, %p1087_p10 }
  0x1f   : > { %p1090_p1 = pnand %p1089_p12, %p1083_p6 }
  0x21   : > { %1093 = shalt.err (!%p1090_p1)
}
  0x22   : > { %s1094_s28 = scalar_lea.vmem %s1290_s8, 2048  ;;  %s1193_s29 = smov [#allocation2]  }
  0x23   : > { %p1095_p2 = scmp.ne.s32.totalorder %s1290_s8, %s1094_s28  ;;  %s1099_s30 = sshll.u32 %s1193_s29, 4  ;;  %s1100_s30 = int_to_ptr.vmem [resolvable:$false] %s1099_s30 }
  0x24   : > { %s1101_s4 = scalar_lea.vmem %s1100_s30, 4096  ;;  %p1102_p9 = scmp.lt.s32.totalorder %s1290_s8, %s1100_s30 }
  0x25   : > { %p1097_p5 = pnand %p1095_p2, %p1081_p3  ;;  %p1103_p4 = scmp.lt.s32.totalorder %s1101_s4, %s1094_s28 }
  0x27   : > { %p1098_p11 = pneg %p1097_p5  ;;  %p1104_p7 = por %p1103_p4, %p1102_p9 }
  0x29   : > { %p1105_p10 = pnand %p1104_p7, %p1098_p11 }
  0x2b   : > { %1108 = shalt.err (!%p1105_p10)
}
  0x2c   : > { %s1194_s5 = smov 64   ;;  %s1195_s7 = smov 4  }
  0x2d   : > { %1002 = dma.hbm_to_vmem [thread:$0]  (!%p1294_p0), %s1288_s6, 2048, %s1290_s8, %s1299_s10, %s1194_s5, %s1194_s5, %s1195_s7  }
  0x2e   : > { %p175_p12 = scmp.lt.s32.totalorder %s1191_s17, 3  ;;  %p1552_p1 = scmp.ge.s32.totalorder %s1191_s17, 1 }
  0x30   : > { %p176_p3 = pnand %p1552_p1, %p175_p12 }
  0x31   : > { %s1331_s11 = sand.u32 (!%p176_p3), 1, %s1175_s13  }
  0x32   : > { %179 = sbr.rel (%p176_p3) target bundleno = 325 (0x145), region = 32  ;;  %s829_s18 = sshll.u32 (!%p176_p3), %s1331_s11, 7 }
  0x33   : > { %s182_s19 = scalar_lea.sflag (!%p176_p3), [#allocation3], %s1331_s11  ;;  %s1337_s21 = scalar_lea.vmem (!%p176_p3), [#allocation2], %s829_s18 }
  0x39   : > { %1162 = dma.done.wait (%p1266_p8), %s182_s19, 2048  }
  0x3a   : > { %1164 = vsyncadd (%p1266_p8), %s182_s19, 4294965248  ;;  %v1061_v0 = vld [vmem:[%s1543_s1] sm:$0xff]   ;;  %v1062_v1 = vld [vmem:[%s1543_s1 + $0x8] sm:$0xff]   ;;  %vm346_vm0 = vcmask 261120   ;;  %vm684_vm1 = vcmask 125952   ;;  %s1396_s23 = scalar_lea.vmem [#allocation5], %s829_s18 }
  0x3b   : > { %955 = vmatprep.subr.bf16.mxu0 %v1061_v0  ;;  %991 = vmatprep.subr.bf16.mxu1 %v1061_v0  ;;  %v1063_v2 = vld [vmem:[%s1337_s21] sm:$0xff]   ;;  %v1065_v4 = vld [vmem:[%s1337_s21 + $0x8] sm:$0xff]   ;;  %v1067_v6 = vld [vmem:[%s1337_s21 + $0x10] sm:$0xff]   ;;  %s936_s28 = sshll.u32 %s1183_s15, 11  ;;  %s734_s29 = sshll.u32 %s1396_s23, 4  ;;  %s1481_s29 = int_to_ptr.vmem [resolvable:$true] %s734_s29 }
  0x3c   : > { %956 = vmatpush3.bf16.msra.mxu0 %v1061_v0  ;;  %993 = vmatpush3.bf16.msra.mxu1 %v1061_v0  ;;  %v1064_v3 = vld [vmem:[%s1337_s21 + $0x40] sm:$0xff]   ;;  %v1066_v5 = vld [vmem:[%s1337_s21 + $0x48] sm:$0xff]   ;;  %v1068_v7 = vld [vmem:[%s1337_s21 + $0x50] sm:$0xff]   ;;  %s1479_s4 = scalar_lea.hbm %s1545_s3, %s936_s28  ;;  %s718_s5 = scalar_lea.sflag [#allocation4], %s1331_s11 }
  0x3d   : > { %957 = vmatprep.subr.bf16.mxu0 %v1062_v1  ;;  %992 = vmatprep.subr.bf16.mxu1 %v1062_v1  ;;  %v1069_v8 = vld [vmem:[%s1337_s21 + $0x18] sm:$0xff]   ;;  %v1071_v10 = vld [vmem:[%s1337_s21 + $0x20] sm:$0xff]   ;;  %v1073_v12 = vld [vmem:[%s1337_s21 + $0x28] sm:$0xff]   ;;  %s1109_s7 = scalar_lea.vmem %s1481_s29, 2048  ;;  %p1553_p9 = scmp.ne.s32.totalorder %s1549_s25, 0 }
  0x3e   : > { %959 = vmatprep.mubr.msk.bf16.mxu0 %vm346_vm0, %v1063_v2  ;;  %975 = vmatprep.mubr.msk.bf16.mxu1 %vm346_vm0, %v1064_v3  ;;  %v1070_v9 = vld [vmem:[%s1337_s21 + $0x58] sm:$0xff]   ;;  %v1072_v11 = vld [vmem:[%s1337_s21 + $0x60] sm:$0xff]   ;;  %v1074_v13 = vld [vmem:[%s1337_s21 + $0x68] sm:$0xff]   ;;  %p1110_p8 = scmp.ne.s32.totalorder %s1481_s29, %s1109_s7  ;;  %s1196_s18 = smov [#allocation5]  }
  0x3f   : > { %v1075_v14 = vld [vmem:[%s1337_s21 + $0x30] sm:$0xff]   ;;  %v1077_v16 = vld [vmem:[%s1337_s21 + $0x38] sm:$0xff]   ;;  %v1384_v18 = vld [vmem:[%s1544_s2] ss:$0 sm:$0xff]  ;;  %s1113_s19 = sshll.u32 %s1196_s18, 4  ;;  %s1114_s19 = int_to_ptr.vmem [resolvable:$false] %s1113_s19 }
  0x40   : > { %958 = vmatpush3.bf16.msra.mxu0 %v1062_v1  ;;  %994 = vmatpush3.bf16.msra.mxu1 %v1062_v1  ;;  %v1076_v15 = vld [vmem:[%s1337_s21 + $0x70] sm:$0xff]   ;;  %v1078_v17 = vld [vmem:[%s1337_s21 + $0x78] sm:$0xff]   ;;  %p1111_p11 = pnand %p1110_p8, %p1553_p9  ;;  %s1115_s21 = scalar_lea.vmem %s1114_s19, 4096 }
  0x41   : > { %p1116_p6 = scmp.lt.s32.totalorder %s1481_s29, %s1114_s19  ;;  %p1117_p13 = scmp.lt.s32.totalorder %s1115_s21, %s1109_s7 }
  0x42   : > { %p1112_p0 = pneg %p1111_p11 }
  0x43   : > { %960 = vmatmul.mubr.msk.bf16.vlgmr.msra.gmra.mrb[0].mxu0 %vm346_vm0, %v1065_v4  ;;  %976 = vmatmul.mubr.msk.bf16.vlgmr.msra.gmra.mrb[0].mxu1 %vm346_vm0, %v1066_v5  ;;  %p1118_p2 = por %p1117_p13, %p1116_p6 }
  0x44   : > { %963 = vmatprep.mubr.msk.bf16.mxu0 %vm346_vm0, %v1067_v6  ;;  %979 = vmatprep.mubr.msk.bf16.mxu1 %vm346_vm0, %v1068_v7 }
  0x45   : > { %p1119_p5 = pnand %p1118_p2, %p1112_p0 }
  0x4b   : > { %964 = vmatmul.mubr.msk.bf16.gmra.mrb[4].mxu0 %vm346_vm0, %v1069_v8  ;;  %980 = vmatmul.mubr.msk.bf16.gmra.mrb[4].mxu1 %vm346_vm0, %v1070_v9 }
  0x4c   : > { %967 = vmatprep.mubr.msk.bf16.mxu0 %vm346_vm0, %v1071_v10  ;;  %983 = vmatprep.mubr.msk.bf16.mxu1 %vm346_vm0, %v1072_v11 }
  0x53   : > { %968 = vmatmul.mubr.msk.bf16.gmra.mrb[8].mxu0 %vm346_vm0, %v1073_v12  ;;  %984 = vmatmul.mubr.msk.bf16.gmra.mrb[8].mxu1 %vm346_vm0, %v1074_v13 }
  0x54   : > { %971 = vmatprep.mubr.msk.bf16.mxu0 %vm346_vm0, %v1075_v14  ;;  %987 = vmatprep.mubr.msk.bf16.mxu1 %vm346_vm0, %v1076_v15 }
  0x5b   : > { %972 = vmatmul.mubr.msk.bf16.gmra.mrb[12].mxu0 %vm346_vm0, %v1077_v16  ;;  %988 = vmatmul.mubr.msk.bf16.gmra.mrb[12].mxu1 %vm346_vm0, %v1078_v17 }
 0x116   : > { %v961_v19 = vpop.f32.mrb[0].mxu0  ;;  %v977_v20 = vpop.f32.mrb[0].mxu1 }
 0x117   : > { %v438_v21 = vadd.f32 %v961_v19, %v1384_v18  ;;  %v502_v22 = vadd.f32 %v977_v20, %v1384_v18  ;;  %v429_v23 = vpop.f32.mrb[1].mxu0  ;;  %v493_v24 = vpop.f32.mrb[1].mxu1 }
 0x118   : > { %v430_v25 = vadd.f32 %v1384_v18, %v429_v23  ;;  %v494_v26 = vadd.f32 %v1384_v18, %v493_v24  ;;  %v962_v27 = vpop.f32.mrb[2].mxu0  ;;  %v978_v28 = vpop.f32.mrb[2].mxu1 }
 0x119   : > { %v906_v29 = vpack.c.bf16 %v438_v21, %v438_v21  ;;  %v922_v30 = vpack.c.bf16 %v502_v22, %v502_v22  ;;  %v441_v31 = vadd.f32 %v962_v27, %v1384_v18  ;;  %v505_v32 = vadd.f32 %v978_v28, %v1384_v18  ;;  %v432_v33 = vpop.f32.mrb[3].mxu0  ;;  %v496_v34 = vpop.f32.mrb[3].mxu1 }
 0x11a   : > { %v904_v35 = vpack.c.bf16 %v430_v25, %v430_v25  ;;  %v920_v36 = vpack.c.bf16 %v494_v26, %v494_v26  ;;  %v433_v37 = vadd.f32 %v1384_v18, %v432_v33  ;;  %v497_v38 = vadd.f32 %v1384_v18, %v496_v34 }
 0x11b   : > { %687 = vst.msk [vmem:[%s1396_s23 + $0x8] sm:$0xf] %vm684_vm1, %v906_v29  ;;  %703 = vst.msk [vmem:[%s1396_s23 + $0x48] sm:$0xf] %vm684_vm1, %v922_v30  ;;  %v907_v39 = vpack.c.bf16 %v441_v31, %v441_v31  ;;  %v923_v40 = vpack.c.bf16 %v505_v32, %v505_v32 }
 0x11c   : > { %685 = vst.msk [vmem:[%s1396_s23] sm:$0xf] %vm684_vm1, %v904_v35  ;;  %701 = vst.msk [vmem:[%s1396_s23 + $0x40] sm:$0xf] %vm684_vm1, %v920_v36  ;;  %v905_v41 = vpack.c.bf16 %v433_v37, %v433_v37  ;;  %v921_v42 = vpack.c.bf16 %v497_v38, %v497_v38 }
 0x11d   : > { %688 = vst.msk [vmem:[%s1396_s23 + $0xc] sm:$0xf] %vm684_vm1, %v907_v39  ;;  %704 = vst.msk [vmem:[%s1396_s23 + $0x4c] sm:$0xf] %vm684_vm1, %v923_v40 }
 0x11e   : > { %686 = vst.msk [vmem:[%s1396_s23 + $0x4] sm:$0xf] %vm684_vm1, %v905_v41  ;;  %702 = vst.msk [vmem:[%s1396_s23 + $0x44] sm:$0xf] %vm684_vm1, %v921_v42  ;;  %v965_v43 = vpop.f32.mrb[4].mxu0  ;;  %v981_v44 = vpop.f32.mrb[4].mxu1 }
 0x11f   : > { %v454_v45 = vadd.f32 %v965_v43, %v1384_v18  ;;  %v518_v46 = vadd.f32 %v981_v44, %v1384_v18  ;;  %v445_v47 = vpop.f32.mrb[5].mxu0  ;;  %v509_v48 = vpop.f32.mrb[5].mxu1 }
 0x120   : > { %v446_v49 = vadd.f32 %v1384_v18, %v445_v47  ;;  %v510_v50 = vadd.f32 %v1384_v18, %v509_v48  ;;  %v966_v51 = vpop.f32.mrb[6].mxu0  ;;  %v982_v52 = vpop.f32.mrb[6].mxu1 }
 0x121   : > { %v910_v53 = vpack.c.bf16 %v454_v45, %v454_v45  ;;  %v926_v54 = vpack.c.bf16 %v518_v46, %v518_v46  ;;  %v457_v55 = vadd.f32 %v966_v51, %v1384_v18  ;;  %v521_v56 = vadd.f32 %v982_v52, %v1384_v18  ;;  %v448_v57 = vpop.f32.mrb[7].mxu0  ;;  %v512_v58 = vpop.f32.mrb[7].mxu1 }
 0x122   : > { %v908_v59 = vpack.c.bf16 %v446_v49, %v446_v49  ;;  %v924_v60 = vpack.c.bf16 %v510_v50, %v510_v50  ;;  %v449_v61 = vadd.f32 %v1384_v18, %v448_v57  ;;  %v513_v62 = vadd.f32 %v1384_v18, %v512_v58 }
 0x123   : > { %691 = vst.msk [vmem:[%s1396_s23 + $0x18] sm:$0xf] %vm684_vm1, %v910_v53  ;;  %707 = vst.msk [vmem:[%s1396_s23 + $0x58] sm:$0xf] %vm684_vm1, %v926_v54  ;;  %v911_v63 = vpack.c.bf16 %v457_v55, %v457_v55  ;;  %v927_v0 = vpack.c.bf16 %v521_v56, %v521_v56 }
 0x124   : > { %689 = vst.msk [vmem:[%s1396_s23 + $0x10] sm:$0xf] %vm684_vm1, %v908_v59  ;;  %705 = vst.msk [vmem:[%s1396_s23 + $0x50] sm:$0xf] %vm684_vm1, %v924_v60  ;;  %v909_v1 = vpack.c.bf16 %v449_v61, %v449_v61  ;;  %v925_v2 = vpack.c.bf16 %v513_v62, %v513_v62 }
 0x125   : > { %692 = vst.msk [vmem:[%s1396_s23 + $0x1c] sm:$0xf] %vm684_vm1, %v911_v63  ;;  %708 = vst.msk [vmem:[%s1396_s23 + $0x5c] sm:$0xf] %vm684_vm1, %v927_v0 }
 0x126   : > { %690 = vst.msk [vmem:[%s1396_s23 + $0x14] sm:$0xf] %vm684_vm1, %v909_v1  ;;  %706 = vst.msk [vmem:[%s1396_s23 + $0x54] sm:$0xf] %vm684_vm1, %v925_v2  ;;  %v969_v3 = vpop.f32.mrb[8].mxu0  ;;  %v985_v4 = vpop.f32.mrb[8].mxu1 }
 0x127   : > { %v470_v5 = vadd.f32 %v969_v3, %v1384_v18  ;;  %v534_v6 = vadd.f32 %v985_v4, %v1384_v18  ;;  %v461_v7 = vpop.f32.mrb[9].mxu0  ;;  %v525_v8 = vpop.f32.mrb[9].mxu1 }
 0x128   : > { %v462_v9 = vadd.f32 %v1384_v18, %v461_v7  ;;  %v526_v10 = vadd.f32 %v1384_v18, %v525_v8  ;;  %v970_v11 = vpop.f32.mrb[10].mxu0  ;;  %v986_v12 = vpop.f32.mrb[10].mxu1 }
 0x129   : > { %v914_v13 = vpack.c.bf16 %v470_v5, %v470_v5  ;;  %v930_v14 = vpack.c.bf16 %v534_v6, %v534_v6  ;;  %v473_v15 = vadd.f32 %v970_v11, %v1384_v18  ;;  %v537_v16 = vadd.f32 %v986_v12, %v1384_v18  ;;  %v464_v17 = vpop.f32.mrb[11].mxu0  ;;  %v528_v19 = vpop.f32.mrb[11].mxu1 }
 0x12a   : > { %v912_v20 = vpack.c.bf16 %v462_v9, %v462_v9  ;;  %v928_v21 = vpack.c.bf16 %v526_v10, %v526_v10  ;;  %v465_v22 = vadd.f32 %v1384_v18, %v464_v17  ;;  %v529_v23 = vadd.f32 %v1384_v18, %v528_v19 }
 0x12b   : > { %695 = vst.msk [vmem:[%s1396_s23 + $0x28] sm:$0xf] %vm684_vm1, %v914_v13  ;;  %711 = vst.msk [vmem:[%s1396_s23 + $0x68] sm:$0xf] %vm684_vm1, %v930_v14  ;;  %v915_v24 = vpack.c.bf16 %v473_v15, %v473_v15  ;;  %v931_v25 = vpack.c.bf16 %v537_v16, %v537_v16 }
 0x12c   : > { %693 = vst.msk [vmem:[%s1396_s23 + $0x20] sm:$0xf] %vm684_vm1, %v912_v20  ;;  %709 = vst.msk [vmem:[%s1396_s23 + $0x60] sm:$0xf] %vm684_vm1, %v928_v21  ;;  %v913_v26 = vpack.c.bf16 %v465_v22, %v465_v22  ;;  %v929_v27 = vpack.c.bf16 %v529_v23, %v529_v23 }
 0x12d   : > { %696 = vst.msk [vmem:[%s1396_s23 + $0x2c] sm:$0xf] %vm684_vm1, %v915_v24  ;;  %712 = vst.msk [vmem:[%s1396_s23 + $0x6c] sm:$0xf] %vm684_vm1, %v931_v25 }
 0x12e   : > { %694 = vst.msk [vmem:[%s1396_s23 + $0x24] sm:$0xf] %vm684_vm1, %v913_v26  ;;  %710 = vst.msk [vmem:[%s1396_s23 + $0x64] sm:$0xf] %vm684_vm1, %v929_v27  ;;  %v973_v28 = vpop.f32.mrb[12].mxu0  ;;  %v989_v29 = vpop.f32.mrb[12].mxu1 }
 0x12f   : > { %v486_v30 = vadd.f32 %v973_v28, %v1384_v18  ;;  %v550_v31 = vadd.f32 %v989_v29, %v1384_v18  ;;  %v477_v32 = vpop.f32.mrb[13].mxu0  ;;  %v541_v33 = vpop.f32.mrb[13].mxu1 }
 0x130   : > { %v478_v34 = vadd.f32 %v1384_v18, %v477_v32  ;;  %v542_v35 = vadd.f32 %v1384_v18, %v541_v33  ;;  %v974_v36 = vpop.f32.mrb[14].mxu0  ;;  %v990_v37 = vpop.f32.mrb[14].mxu1 }
 0x131   : > { %v918_v38 = vpack.c.bf16 %v486_v30, %v486_v30  ;;  %v934_v39 = vpack.c.bf16 %v550_v31, %v550_v31  ;;  %v489_v40 = vadd.f32 %v974_v36, %v1384_v18  ;;  %v553_v41 = vadd.f32 %v990_v37, %v1384_v18  ;;  %v480_v42 = vpop.f32.mrb[15].mxu0  ;;  %v544_v43 = vpop.f32.mrb[15].mxu1 }
 0x132   : > { %v916_v44 = vpack.c.bf16 %v478_v34, %v478_v34  ;;  %v932_v45 = vpack.c.bf16 %v542_v35, %v542_v35  ;;  %v481_v46 = vadd.f32 %v1384_v18, %v480_v42  ;;  %v545_v47 = vadd.f32 %v1384_v18, %v544_v43 }
 0x133   : > { %699 = vst.msk [vmem:[%s1396_s23 + $0x38] sm:$0xf] %vm684_vm1, %v918_v38  ;;  %715 = vst.msk [vmem:[%s1396_s23 + $0x78] sm:$0xf] %vm684_vm1, %v934_v39  ;;  %v919_v48 = vpack.c.bf16 %v489_v40, %v489_v40  ;;  %v935_v49 = vpack.c.bf16 %v553_v41, %v553_v41 }
 0x134   : > { %697 = vst.msk [vmem:[%s1396_s23 + $0x30] sm:$0xf] %vm684_vm1, %v916_v44  ;;  %713 = vst.msk [vmem:[%s1396_s23 + $0x70] sm:$0xf] %vm684_vm1, %v932_v45  ;;  %v917_v18 = vpack.c.bf16 %v481_v46, %v481_v46  ;;  %v933_v50 = vpack.c.bf16 %v545_v47, %v545_v47 }
 0x135   : > { %700 = vst.msk [vmem:[%s1396_s23 + $0x3c] sm:$0xf] %vm684_vm1, %v919_v48  ;;  %716 = vst.msk [vmem:[%s1396_s23 + $0x7c] sm:$0xf] %vm684_vm1, %v935_v49 }
 0x136   : > { %698 = vst.msk [vmem:[%s1396_s23 + $0x34] sm:$0xf] %vm684_vm1, %v917_v18  ;;  %714 = vst.msk [vmem:[%s1396_s23 + $0x74] sm:$0xf] %vm684_vm1, %v933_v50 }
 0x137   : > { %1122 = shalt.err (!%p1119_p5)
}
 0x138   : > { %s1123_s6 = scalar_lea.hbm %s1479_s4, 2048  ;;  %s1127_s10 = scalar_lea.hbm %s1545_s3, 4096 }
 0x139   : > { %p1124_p4 = scmp.ne.s32.totalorder %s1479_s4, %s1123_s6  ;;  %p1128_p12 = scmp.lt.u32.totalorder %s1479_s4, %s1545_s3 }
 0x13a   : > { %p1129_p1 = scmp.lt.u32.totalorder %s1127_s10, %s1123_s6  ;;  %p1131_p8 = scmp.lt.u32.totalorder %s1123_s6, %s1479_s4 }
 0x13b   : > { %p1125_p7 = pnand %p1124_p4, %p1553_p9 }
 0x13c   : > { %p1130_p3 = por %p1129_p1, %p1128_p12 }
 0x13d   : > { %p1126_p10 = pneg %p1125_p7 }
 0x13e   : > { %p1132_p11 = por %p1131_p8, %p1130_p3 }
 0x140   : > { %p1133_p0 = pnand %p1132_p11, %p1126_p10 }
 0x142   : > { %1136 = shalt.err (!%p1133_p0)
}
 0x143   : > { %s1197_s23 = smov 64   ;;  %s1198_s28 = smov 4  }
 0x144   : > { %997 = dma.vmem_to_hbm [thread:$0]  (%p1553_p9), %s1481_s29, 2048, %s1479_s4, %s718_s5, %s1197_s23, %s1197_s23, %s1198_s28  }
 0x145 PF: > { %s749_s15 = sand.u32 1, %s1171_s12   ;;  %p1554_p6 = scmp.ne.s32.totalorder %s1550_s27, 0 }
 0x146   : > { %p1555_p13 = scmp.ge.s32.totalorder %s1191_s17, 2  ;;  %s750_s30 = scalar_lea.sflag [#allocation4], %s749_s15 }
 0x148   : > { %p1004_p2 = pnand %p1555_p13, %p1554_p6 }
 0x14a   : > { %1166 = dma.done.wait (!%p1004_p2), %s750_s30, 2048  }
 0x14b   : > { %1168 = vsyncadd (!%p1004_p2), %s750_s30, 4294965248  ;;  %s19_s17 = sadd.s32 1, %s1191_s17   ;;  %s1556_s12 = smov %s1175_s13 }
 0x14c   : > { %p16_p5 = scmp.ge.s32.totalorder %s19_s17, 4   ;;  %s1557_s13 = smov %s1179_s14 }
 0x14d   : > { %s1558_s14 = smov %s1275_s26  ;;  %s1559_s15 = smov %s1187_s16 }
 0x14e   : > { %s1560_s16 = smov %s1562_s20  ;;  %18 = sbr.rel (!%p16_p5) target bundleno = 6 (0x6), region = 77 }
 0x155   :  { %755 = vsyncpa [#allocation3], 1 }
 0x156   :  { %757 = vsyncpa [#allocation3 + $0x1], 1 }
 0x157   :  { %758 = vsyncpa [#allocation4], 1 }
 0x158   :  { %760 = vsyncpa [#allocation4 + $0x1], 1 }

</bundles_post_ra>
